<compile_context>
chip_gen: v6e
topology: v6e:2x2x1
jax: 0.10.0
libtpu: 0.0.40
codegen_flags: <defaults>
</compile_context>

<pallas_src>
import functools

import jax
import jax.numpy as jnp
from jax.experimental import pallas as pl
from jax.experimental.pallas import tpu as pltpu


def _round_up(x, m):
    return -(-x // m) * m


def _pick_t_block(T, cap=4096, min_blk=1024):
    """Pick a lane-dense (multiple of 128) time tile; T is padded up to it."""
    Tp = _round_up(T, 128)
    if Tp <= cap:
        return Tp                    # single tile covers small / medium T
    best_blk, best_waste = None, None
    for blk in range(min_blk, cap + 1, 128):
        waste = _round_up(T, blk) - T
        if best_waste is None or waste < best_waste or (
                waste == best_waste and blk > best_blk):
            best_blk, best_waste = blk, waste
    return best_blk


def _dilated_residual_kernel(x_ref, w3_ref, b3_ref, w1_ref, b1_ref, o_ref, xs_ref,
                             *, C, T_pad, T_BLK, nT, dilation, compute_dtype):
    # x_ref : (C, T_pad)    f32, full (padded) time axis of one batch element
    # w3_ref: (Cout, 3*C)   fused dilated-conv weights [x[t-d] | x[t] | x[t+d]]
    # b3_ref: (Cout, 1)     f32
    # w1_ref: (Cout, Cout)  1x1 conv
    # b1_ref: (Cout, 1)     f32
    # o_ref : (Cout, T_BLK) output time tile
    # xs_ref: (3*C, T_BLK)  per-tile stacked-tap staging tile (compute dtype)
    i = pl.program_id(1)
    cd = compute_dtype
    d = dilation
    q, r = divmod(d, T_BLK)          # static: shift = q whole blocks + r columns

    t0 = pl.multiple_of(i * T_BLK, T_BLK)
    xc_f32 = x_ref[:, pl.ds(t0, T_BLK)]          # center tap + exact residual (f32)
    xc = xc_f32.astype(cd)

    def read_part(blk, col_lo, width, valid):
        """Columns [col_lo, col_lo+width) of time-block `blk`; zeros when invalid.

        The block read is lane-aligned (start is a multiple of T_BLK); the
        column selection is a static value slice.  Out-of-range block indices
        are clamped so the read stays in-bounds and are then masked to zero —
        this realizes the conv's 'same' zero padding in-kernel.
        """
        safe = pl.multiple_of(jnp.clip(blk, 0, nT - 1) * T_BLK, T_BLK)
        v = x_ref[:, pl.ds(safe, T_BLK)][:, col_lo:col_lo + width].astype(cd)
        return v * valid.astype(cd)

    # Stack the three dilated-conv taps:
    #   rows [0 , C ) : x[t - d]   (zeros where t - d < 0)
    #   rows [C , 2C) : x[t]
    #   rows [2C, 3C) : x[t + d]   (zeros where t + d >= T_pad)
    xs_ref[C:2 * C, :] = xc
    if r == 0:
        # d is a whole number of blocks: each tap is a single (shifted) block.
        xs_ref[0:C, :] = xc if q == 0 else read_part(i - q, 0, T_BLK, i >= q)
        xs_ref[2 * C:3 * C, :] = (xc if q == 0
                                  else read_part(i + q, 0, T_BLK, i + q <= nT - 1))
    else:
        # x[t-d]: tail of block (i-q-1) followed by head of block (i-q).
        xs_ref[0:C, 0:r] = read_part(i - q - 1, T_BLK - r, r, i >= q + 1)
        xs_ref[0:C, r:T_BLK] = (xc[:, 0:T_BLK - r] if q == 0
                                else read_part(i - q, 0, T_BLK - r, i >= q))
        # x[t+d]: tail of block (i+q) from column r, then head of block (i+q+1).
        xs_ref[2 * C:3 * C, 0:T_BLK - r] = (
            xc[:, r:T_BLK] if q == 0
            else read_part(i + q, r, T_BLK - r, i + q <= nT - 1))
        xs_ref[2 * C:3 * C, T_BLK - r:T_BLK] = read_part(i + q + 1, 0, r,
                                                         i + q + 1 <= nT - 1)

    # Fused 3-tap dilated conv: ONE MXU dot with K = 3*C.
    h = jnp.dot(w3_ref[...], xs_ref[...], preferred_element_type=jnp.float32)
    h = jnp.maximum(h + b3_ref[...], 0.0)                      # bias + ReLU in f32

    # 1x1 conv.
    out = jnp.dot(w1_ref[...], h.astype(cd),
                  preferred_element_type=jnp.float32) + b1_ref[...]

    # dropout: identity (eval mode); residual from the exact f32 input.
    o_ref[...] = (xc_f32 + out).astype(o_ref.dtype)


def dilated_residual_layer(x_bct, w3, b3, w1, b1, dilation, *,
                           compute_dtype=jnp.float32, t_block=None):
    """x_bct: (B, C, T) float32 (PyTorch NCW layout).  Returns (B, C, T) f32.

    compute_dtype: dtype fed to the MXU dots and used to stage the stacked-tap
    activations (jnp.bfloat16 recommended on v5e/v6e/v7x unless bit-exact
    results vs. the f32 reference are required).  Bias, ReLU and the residual
    add are always performed in f32.
    """
    B, C, T = x_bct.shape
    Cout, Cin, K = w3.shape
    assert K == 3 and Cin == C and Cout == C, "residual add requires in == out channels"

    T_BLK = _pick_t_block(T) if t_block is None else int(t_block)
    assert T_BLK % 128 == 0, "time tile must be lane-dense (multiple of 128)"
    T_pad = _round_up(T, T_BLK)
    nT = T_pad // T_BLK

    x = x_bct.astype(jnp.float32)
    if T_pad != T:
        x = jnp.pad(x, ((0, 0), (0, 0), (0, T_pad - T)))      # zero pad == conv padding

    # Conv1d weight (out, in, k) -> fused (out, 3*in): columns ordered
    # [tap k=0 (x[t-d]) | tap k=1 (x[t]) | tap k=2 (x[t+d])], channel-major.
    w3f = jnp.transpose(w3, (0, 2, 1)).reshape(Cout, 3 * Cin).astype(compute_dtype)
    w1m = w1[:, :, 0].astype(compute_dtype)                    # (Cout, Cout)
    b3c = b3.reshape(Cout, 1).astype(jnp.float32)
    b1c = b1.reshape(Cout, 1).astype(jnp.float32)

    kernel = functools.partial(
        _dilated_residual_kernel,
        C=C, T_pad=T_pad, T_BLK=T_BLK, nT=nT,
        dilation=int(dilation), compute_dtype=compute_dtype)

    # VMEM budget: resident x + output tile (double-buffered) + staging tile.
    item_c = jnp.dtype(compute_dtype).itemsize
    vmem_need = (2 * C * T_pad * 4                 # resident x, double-buffered
                 + 2 * Cout * T_BLK * 4            # output tile, double-buffered
                 + 3 * C * T_BLK * item_c          # stacked-tap staging tile
                 + 4 * Cout * T_BLK * 4            # f32 intermediates (h, out)
                 + 4 * (Cout * 3 * Cin + Cout * Cout + 2 * Cout) * 4)
    vmem_limit = int(min(max(vmem_need + (4 << 20), 32 << 20), 96 << 20))

    out = pl.pallas_call(
        kernel,
        out_shape=jax.ShapeDtypeStruct((B, Cout, T_pad), jnp.float32),
        grid_spec=pltpu.PrefetchScalarGridSpec(
            num_scalar_prefetch=0,
            grid=(B, nT),
            in_specs=[
                pl.BlockSpec((None, C, T_pad), lambda b, i: (b, 0, 0)),   # x resident per batch
                pl.BlockSpec((Cout, 3 * Cin), lambda b, i: (0, 0)),       # fused dilated weights
                pl.BlockSpec((Cout, 1), lambda b, i: (0, 0)),
                pl.BlockSpec((Cout, Cout), lambda b, i: (0, 0)),
                pl.BlockSpec((Cout, 1), lambda b, i: (0, 0)),
            ],
            out_specs=pl.BlockSpec((None, Cout, T_BLK), lambda b, i: (b, 0, i)),
            scratch_shapes=[pltpu.VMEM((3 * C, T_BLK), compute_dtype)],   # per-tile staging
        ),
        compiler_params=pltpu.CompilerParams(
            dimension_semantics=("parallel", "parallel"),
            vmem_limit_bytes=vmem_limit,
        ),
    )(x, w3f, b3c, w1m, b1c)

    if T_pad != T:
        out = out[:, :, :T]
    return out                                                           # (B, C, T)


def _reference(x_bct, w3, b3, w1, b1, dilation):
    """Pure-JAX reference (lax conv) matching PyTorch semantics."""
    out = jax.lax.conv_general_dilated(
        x_bct, w3, window_strides=(1,), padding=[(dilation, dilation)],
        rhs_dilation=(dilation,), dimension_numbers=("NCH", "OIH", "NCH"))
    out = out + b3[None, :, None]
    out = jnp.maximum(out, 0.0)
    out = jax.lax.conv_general_dilated(
        out, w1, window_strides=(1,), padding=[(0, 0)],
        dimension_numbers=("NCH", "OIH", "NCH"))
    out = out + b1[None, :, None]
    return x_bct + out


def _make_params(key, C):
    k_w3, k_b3, k_w1, k_b1 = jax.random.split(key, 4)
    w3 = 0.1 * jax.random.normal(k_w3, (C, C, 3), dtype=jnp.float32)     # (out, in, k)
    b3 = 0.1 * jax.random.normal(k_b3, (C,), dtype=jnp.float32)
    w1 = 0.1 * jax.random.normal(k_w1, (C, C, 1), dtype=jnp.float32)
    b1 = 0.1 * jax.random.normal(k_b1, (C,), dtype=jnp.float32)
    return w3, b3, w1, b1


if __name__ == "__main__":
    key = jax.random.PRNGKey(0)
    k0, k1, k2, k3 = jax.random.split(key, 4)

    # --- primary small config (module-scale) ----------------------------------
    B, C, T, dilation = 2, 4, 16, 2
    x = jax.random.normal(k0, (B, C, T), dtype=jnp.float32)
    w3, b3, w1, b1 = _make_params(k1, C)

    y_ref = _reference(x, w3, b3, w1, b1, dilation)
    y = jax.block_until_ready(dilated_residual_layer(x, w3, b3, w1, b1, dilation))
    assert y.shape == (B, C, T)
    assert jnp.allclose(y, y_ref, atol=1e-5, rtol=1e-5)

    # bf16 MXU/staging path (recommended on v5e/v6e/v7x); residual stays f32.
    y_bf = jax.block_until_ready(
        dilated_residual_layer(x, w3, b3, w1, b1, dilation,
                               compute_dtype=jnp.bfloat16))
    assert jnp.allclose(y_bf, y_ref, atol=5e-2, rtol=5e-2)

    # --- multi-tile + ragged-T path (exercises left/right boundary tiles) -----
    B2, C2, T2, d2 = 1, 8, 300, 4
    x2 = jax.random.normal(k2, (B2, C2, T2), dtype=jnp.float32)
    p2 = _make_params(k3, C2)
    y2_ref = _reference(x2, *p2, d2)
    y2 = jax.block_until_ready(
        dilated_residual_layer(x2, *p2, d2, t_block=128))     # T padded 300 -> 384, 3 tiles
    assert jnp.allclose(y2, y2_ref, atol=1e-5, rtol=1e-5)

    # dilation larger than the time tile (q > 0 path).
    d3 = 150
    y3_ref = _reference(x2, *p2, d3)
    y3 = jax.block_until_ready(dilated_residual_layer(x2, *p2, d3, t_block=128))
    assert jnp.allclose(y3, y3_ref, atol=1e-5, rtol=1e-5)

    print("KERNEL_OK")
</pallas_src>

<mosaic_0001>
module attributes {stable_mosaic.version = 11 : i64} {
  func.func @_dilated_residual_kernel(%arg0: i32, %arg1: i32, %arg2: memref<1x4x128xf32, #tpu.memory_space<vmem>>, %arg3: memref<4x12xf32, #tpu.memory_space<vmem>>, %arg4: memref<4x1xf32, #tpu.memory_space<vmem>>, %arg5: memref<4x4xf32, #tpu.memory_space<vmem>>, %arg6: memref<4x1xf32, #tpu.memory_space<vmem>>, %arg7: memref<1x4x128xf32, #tpu.memory_space<vmem>>, %arg8: memref<12x128xf32, #tpu.memory_space<vmem>>) attributes {dimension_semantics = [#tpu.dimension_semantics<parallel>, #tpu.dimension_semantics<parallel>], iteration_bounds = array<i64: 2, 1>, scalar_prefetch = 0 : i64, scratch_operands = 1 : i64, tpu.core_type = #tpu.core_type<tc>, window_params = [{transform_indices = @transform_0, window_bounds = array<i64: 1, 4, 128>}, {pipeline_mode = #tpu.pipeline_mode<synchronous>, transform_indices = @transform_1, window_bounds = array<i64: 4, 12>}, {pipeline_mode = #tpu.pipeline_mode<synchronous>, transform_indices = @transform_2, window_bounds = array<i64: 4, 1>}, {pipeline_mode = #tpu.pipeline_mode<synchronous>, transform_indices = @transform_3, window_bounds = array<i64: 4, 4>}, {pipeline_mode = #tpu.pipeline_mode<synchronous>, transform_indices = @transform_4, window_bounds = array<i64: 4, 1>}, {transform_indices = @transform_5, window_bounds = array<i64: 1, 4, 128>}]} {
    %c128_i32 = arith.constant 128 : i32
    %0 = arith.muli %arg1, %c128_i32 : i32
    %1 = tpu.assume_multiple %0, 128 : i32
    %c0 = arith.constant 0 : index
    %c0_0 = arith.constant 0 : index
    %2 = arith.index_cast %1 : i32 to index
    %3 = vector.load %arg2[%c0, %c0_0, %2] : memref<1x4x128xf32, #tpu.memory_space<vmem>>, vector<1x4x128xf32>
    %4 = vector.shape_cast %3 : vector<1x4x128xf32> to vector<4x128xf32>
    %c4 = arith.constant 4 : index
    %c0_1 = arith.constant 0 : index
    %5 = vector.load %arg8[%c4, %c0_1] : memref<12x128xf32, #tpu.memory_space<vmem>>, vector<4x128xf32>
    tpu.vector_store %arg8[%c4, %c0_1], %4 {strides = array<i32>} : memref<12x128xf32, #tpu.memory_space<vmem>>, vector<4x128xf32>,
    %c0_i32 = arith.constant 0 : i32
    %6 = arith.subi %arg1, %c0_i32 : i32
    %c1_i32 = arith.constant 1 : i32
    %7 = arith.subi %6, %c1_i32 : i32
    %c1_i32_2 = arith.constant 1 : i32
    %8 = arith.cmpi sge, %arg1, %c1_i32_2 : i32
    %c0_i32_3 = arith.constant 0 : i32
    %c0_i32_4 = arith.constant 0 : i32
    %9 = arith.maxsi %c0_i32_3, %7 : i32
    %10 = arith.minsi %c0_i32_4, %9 : i32
    %c128_i32_5 = arith.constant 128 : i32
    %11 = arith.muli %10, %c128_i32_5 : i32
    %12 = tpu.assume_multiple %11, 128 : i32
    %c0_6 = arith.constant 0 : index
    %c0_7 = arith.constant 0 : index
    %13 = arith.index_cast %12 : i32 to index
    %14 = vector.load %arg2[%c0_6, %c0_7, %13] : memref<1x4x128xf32, #tpu.memory_space<vmem>>, vector<1x4x128xf32>
    %15 = vector.shape_cast %14 : vector<1x4x128xf32> to vector<4x128xf32>
    %16 = vector.extract_strided_slice %15 {offsets = [0, 126], sizes = [4, 2], strides = [1, 1]} : vector<4x128xf32> to vector<4x2xf32>
    %17 = arith.extui %8 : i1 to i32
    %18 = arith.sitofp %17 : i32 to f32
    %19 = vector.broadcast %18 : f32 to vector<4x2xf32>
    %20 = arith.mulf %16, %19 : vector<4x2xf32>
    %c0_8 = arith.constant 0 : index
    %c0_9 = arith.constant 0 : index
    %21 = vector.load %arg8[%c0_8, %c0_9] : memref<12x128xf32, #tpu.memory_space<vmem>>, vector<4x2xf32>
    tpu.vector_store %arg8[%c0_8, %c0_9], %20 {strides = array<i32>} : memref<12x128xf32, #tpu.memory_space<vmem>>, vector<4x2xf32>,
    %22 = vector.extract_strided_slice %4 {offsets = [0, 0], sizes = [4, 126], strides = [1, 1]} : vector<4x128xf32> to vector<4x126xf32>
    %c0_10 = arith.constant 0 : index
    %c2 = arith.constant 2 : index
    %23 = vector.load %arg8[%c0_10, %c2] : memref<12x128xf32, #tpu.memory_space<vmem>>, vector<4x126xf32>
    tpu.vector_store %arg8[%c0_10, %c2], %22 {strides = array<i32>} : memref<12x128xf32, #tpu.memory_space<vmem>>, vector<4x126xf32>,
    %24 = vector.extract_strided_slice %4 {offsets = [0, 2], sizes = [4, 126], strides = [1, 1]} : vector<4x128xf32> to vector<4x126xf32>
    %c8 = arith.constant 8 : index
    %c0_11 = arith.constant 0 : index
    %25 = vector.load %arg8[%c8, %c0_11] : memref<12x128xf32, #tpu.memory_space<vmem>>, vector<4x126xf32>
    tpu.vector_store %arg8[%c8, %c0_11], %24 {strides = array<i32>} : memref<12x128xf32, #tpu.memory_space<vmem>>, vector<4x126xf32>,
    %c0_i32_12 = arith.constant 0 : i32
    %26 = arith.addi %arg1, %c0_i32_12 : i32
    %c1_i32_13 = arith.constant 1 : i32
    %27 = arith.addi %26, %c1_i32_13 : i32
    %c0_i32_14 = arith.constant 0 : i32
    %28 = arith.addi %arg1, %c0_i32_14 : i32
    %c1_i32_15 = arith.constant 1 : i32
    %29 = arith.addi %28, %c1_i32_15 : i32
    %c0_i32_16 = arith.constant 0 : i32
    %30 = arith.cmpi sle, %29, %c0_i32_16 : i32
    %c0_i32_17 = arith.constant 0 : i32
    %c0_i32_18 = arith.constant 0 : i32
    %31 = arith.maxsi %c0_i32_17, %27 : i32
    %32 = arith.minsi %c0_i32_18, %31 : i32
    %c128_i32_19 = arith.constant 128 : i32
    %33 = arith.muli %32, %c128_i32_19 : i32
    %34 = tpu.assume_multiple %33, 128 : i32
    %c0_20 = arith.constant 0 : index
    %c0_21 = arith.constant 0 : index
    %35 = arith.index_cast %34 : i32 to index
    %36 = vector.load %arg2[%c0_20, %c0_21, %35] : memref<1x4x128xf32, #tpu.memory_space<vmem>>, vector<1x4x128xf32>
    %37 = vector.shape_cast %36 : vector<1x4x128xf32> to vector<4x128xf32>
    %38 = vector.extract_strided_slice %37 {offsets = [0, 0], sizes = [4, 2], strides = [1, 1]} : vector<4x128xf32> to vector<4x2xf32>
    %39 = arith.extui %30 : i1 to i32
    %40 = arith.sitofp %39 : i32 to f32
    %41 = vector.broadcast %40 : f32 to vector<4x2xf32>
    %42 = arith.mulf %38, %41 : vector<4x2xf32>
    %c8_22 = arith.constant 8 : index
    %c126 = arith.constant 126 : index
    %43 = vector.load %arg8[%c8_22, %c126] : memref<12x128xf32, #tpu.memory_space<vmem>>, vector<4x2xf32>
    tpu.vector_store %arg8[%c8_22, %c126], %42 {strides = array<i32>} : memref<12x128xf32, #tpu.memory_space<vmem>>, vector<4x2xf32>,
    %c0_23 = arith.constant 0 : index
    %c0_24 = arith.constant 0 : index
    %44 = vector.load %arg3[%c0_23, %c0_24] : memref<4x12xf32, #tpu.memory_space<vmem>>, vector<4x12xf32>
    %c0_25 = arith.constant 0 : index
    %c0_26 = arith.constant 0 : index
    %45 = vector.load %arg8[%c0_25, %c0_26] : memref<12x128xf32, #tpu.memory_space<vmem>>, vector<12x128xf32>
    %cst = arith.constant dense<0.000000e+00> : vector<4x128xf32>
    %46 = tpu.matmul %44, %45, %cst {dimension_numbers = #tpu.dot_dimension_numbers<[1], [0], [0], [1], [0, 0, 1, 1], [], []>} : vector<4x12xf32>, vector<12x128xf32>, vector<4x128xf32> -> vector<4x128xf32>
    %c0_27 = arith.constant 0 : index
    %c0_28 = arith.constant 0 : index
    %47 = vector.load %arg4[%c0_27, %c0_28] : memref<4x1xf32, #tpu.memory_space<vmem>>, vector<4x1xf32>
    %48 = vector.broadcast %47 : vector<4x1xf32> to vector<4x128xf32>
    %49 = arith.addf %46, %48 : vector<4x128xf32>
    %cst_29 = arith.constant 0.000000e+00 : f32
    %50 = vector.broadcast %cst_29 : f32 to vector<4x128xf32>
    %51 = arith.maximumf %49, %50 : vector<4x128xf32>
    %c0_30 = arith.constant 0 : index
    %c0_31 = arith.constant 0 : index
    %52 = vector.load %arg5[%c0_30, %c0_31] : memref<4x4xf32, #tpu.memory_space<vmem>>, vector<4x4xf32>
    %cst_32 = arith.constant dense<0.000000e+00> : vector<4x128xf32>
    %53 = tpu.matmul %52, %51, %cst_32 {dimension_numbers = #tpu.dot_dimension_numbers<[1], [0], [0], [1], [0, 0, 1, 1], [], []>} : vector<4x4xf32>, vector<4x128xf32>, vector<4x128xf32> -> vector<4x128xf32>
    %c0_33 = arith.constant 0 : index
    %c0_34 = arith.constant 0 : index
    %54 = vector.load %arg6[%c0_33, %c0_34] : memref<4x1xf32, #tpu.memory_space<vmem>>, vector<4x1xf32>
    %55 = vector.broadcast %54 : vector<4x1xf32> to vector<4x128xf32>
    %56 = arith.addf %53, %55 : vector<4x128xf32>
    %57 = arith.addf %4, %56 : vector<4x128xf32>
    %c0_35 = arith.constant 0 : index
    %c0_36 = arith.constant 0 : index
    %c0_37 = arith.constant 0 : index
    %58 = vector.load %arg7[%c0_35, %c0_36, %c0_37] : memref<1x4x128xf32, #tpu.memory_space<vmem>>, vector<1x4x128xf32>
    %59 = vector.shape_cast %58 : vector<1x4x128xf32> to vector<4x128xf32>
    %60 = vector.shape_cast %57 : vector<4x128xf32> to vector<1x4x128xf32>
    tpu.vector_store %arg7[%c0_35, %c0_36, %c0_37], %60 {strides = array<i32>} : memref<1x4x128xf32, #tpu.memory_space<vmem>>, vector<1x4x128xf32>,
    return
  }
  func.func @transform_0(%arg0: i32, %arg1: i32) -> (i32, i32, i32) {
    %c0_i32 = arith.constant 0 : i32
    %c0_i32_0 = arith.constant 0 : i32
    %c0_i32_1 = arith.constant 0 : i32
    return %arg0, %c0_i32, %c0_i32_0 : i32, i32, i32
  }
  func.func @transform_1(%arg0: i32, %arg1: i32) -> (i32, i32) {
    %c0_i32 = arith.constant 0 : i32
    %c0_i32_0 = arith.constant 0 : i32
    %c0_i32_1 = arith.constant 0 : i32
    return %c0_i32, %c0_i32_0 : i32, i32
  }
  func.func @transform_2(%arg0: i32, %arg1: i32) -> (i32, i32) {
    %c0_i32 = arith.constant 0 : i32
    %c0_i32_0 = arith.constant 0 : i32
    %c0_i32_1 = arith.constant 0 : i32
    return %c0_i32, %c0_i32_0 : i32, i32
  }
  func.func @transform_3(%arg0: i32, %arg1: i32) -> (i32, i32) {
    %c0_i32 = arith.constant 0 : i32
    %c0_i32_0 = arith.constant 0 : i32
    %c0_i32_1 = arith.constant 0 : i32
    return %c0_i32, %c0_i32_0 : i32, i32
  }
  func.func @transform_4(%arg0: i32, %arg1: i32) -> (i32, i32) {
    %c0_i32 = arith.constant 0 : i32
    %c0_i32_0 = arith.constant 0 : i32
    %c0_i32_1 = arith.constant 0 : i32
    return %c0_i32, %c0_i32_0 : i32, i32
  }
  func.func @transform_5(%arg0: i32, %arg1: i32) -> (i32, i32, i32) {
    %c0_i32 = arith.constant 0 : i32
    %c0_i32_0 = arith.constant 0 : i32
    return %arg0, %c0_i32, %arg1 : i32, i32, i32
  }
}

</mosaic_0001>

<bundles_post_ra>
// kernel: tpu_custom_call.1
= control target key start
LH: loop header
LB: loop body
LE: loop exit
PB: predicated region body
PF: predicated region fallthrough
CT: control target
= control target key end

     0   :  { %10 = vsyncpa [#allocation4], 0  ;;  %s961_s0 = inlined_call_operand.vmem [shape: f32[2,4,128], index: 0, kind: input, shape index: {}]   ;;  %s962_s1 = inlined_call_operand.hbm [shape: f32[4,12], index: 1, kind: input, shape index: {}]   ;;  %s963_s2 = inlined_call_operand.vmem [shape: f32[4,1], index: 2, kind: input, shape index: {}]   ;;  %s964_s3 = inlined_call_operand.vmem [shape: f32[4,4], index: 3, kind: input, shape index: {}]   ;;  %s965_s4 = inlined_call_operand.vmem [shape: f32[4,1], index: 4, kind: input, shape index: {}]   ;;  %s966_s5 = inlined_call_operand.hbm [shape: f32[2,4,128], index: 5, kind: output, shape index: {}]  }
   0x1   :  { %11 = vsyncpa [#allocation5], 0 }
   0x2   :  { %13 = vsyncpa [#allocation5 + $0x1], 0  ;;  %s830_s18 = smov 0   ;;  %s832_s19 = smov 0  }
   0x3   :  { %s834_s20 = smov 0   ;;  %s836_s21 = smov 0  }
   0x4   :  { %s838_s22 = smov 0   ;;  %s840_s23 = smov 0  }
   0x5 LB: > { %s578_s24 = sadd.s32 4294967295, %s791_s23   ;;  %s579_s25 = sadd.s32 4294967294, %s791_s23   ;;  %s791_s23 = sphi %s840_s23, %s19_s23   ;;  %s787_s22 = sphi %s838_s22, %s975_s22   ;;  %s783_s21 = sphi %s836_s21, %s974_s21   ;;  %s779_s20 = sphi %s834_s20, %s973_s20   ;;  %s775_s19 = sphi %s832_s19, %s972_s19   ;;  %s771_s18 = sphi %s830_s18, %s971_s18  }
   0x6   : > { %s31_s26 = sadd.s32 1, %s787_s22  ;;  %s150_s27 = sadd.s32 1, %s779_s20 }
   0x7   : > { %p33_p0 = scmp.ge.s32.totalorder %s31_s26, 2  ;;  %p160_p1 = scmp.ne.s32.totalorder %s779_s20, %s775_s19 }
   0x8   : > { %p161_p2 = scmp.eq.s32.totalorder %s578_s24, 1  ;;  %p166_p3 = scmp.ne.s32.totalorder %s775_s19, %s771_s18 }
   0x9   : > { %s977_s26 = smov (%p33_p0, %s31_s26), 0  ;;  %p167_p5 = scmp.eq.s32.totalorder %s579_s25, 1 }
   0xa   : > { %p870_p4 = por %p161_p2, %p160_p1  ;;  %s145_s29 = ssub.s32 %s787_s22, %s977_s26 }
   0xb   : > { %p580_p6 = scmp.ge.s32.totalorder %s791_s23, 1  ;;  %p148_p7 = scmp.eq.s32.totalorder %s145_s29, 0 }
   0xc   : > { %p877_p8 = por %p167_p5, %p166_p3  ;;  %p174_p9 = scmp.lt.s32.totalorder %s791_s23, 3 }
   0xd   : > { %s883_s6 = scalar_select %p148_p7, %s779_s20, %s150_s27  }
   0xe   : > { %p885_p10 = pnand %p580_p6, %p174_p9  ;;  %p889_p11 = scmp.eq.s32.totalorder %s578_s24, 0 }
   0xf   : > { %s793_s9 = smov [#allocation3]  }
  0x10   : > { %p618_p12 = pneg %p885_p10  ;;  %s187_s10 = sshll.u32 %s793_s9, 4  ;;  %s188_s10 = int_to_ptr.vmem [resolvable:$true] %s187_s10 }
  0x11   : > { %s696_s11 = scalar_lea.vmem %s188_s10, 64  ;;  %p704_p5 = scmp.lt.s32.totalorder %s188_s10, %s188_s10 }
  0x12   : > { %p619_p13 = pnand %p889_p11, %p618_p12  ;;  %p697_p1 = scmp.ne.s32.totalorder %s188_s10, %s696_s11 }
  0x13   : > { %p705_p6 = scmp.lt.s32.totalorder %s696_s11, %s696_s11 }
  0x14   : > { %p687_p0 = pneg %p619_p13 }
  0x15   : > { %p706_p7 = por %p705_p6, %p704_p5 }
  0x16   : > { %p699_p2 = pnand %p697_p1, %p687_p0 }
  0x18   : > { %p700_p3 = pneg %p699_p2 }
  0x1a   : > { %p707_p9 = pnand %p706_p7, %p700_p3 }
  0x1c   : > { %710 = shalt.err (!%p707_p9)
}
  0x1d   : > { %621 = dma.hbm_to_vmem [thread:$0]  (!%p619_p13), %s962_s1, 64, %s188_s10, [#allocation4]  }
  0x1e   : > { %216 = sbr.rel (%p885_p10) target bundleno = 582 (0x246), region = 40 }
  0x23   : > { %762 = dma.done.wait (%p889_p11), [#allocation4], 64  }
  0x24   : > { %764 = vsyncadd (%p889_p11), [#allocation4], 4294967232  ;;  %p243_p12 = scmp.lt.s32.totalorder %s783_s21, 1  ;;  %v794_v0 = vmov 0.0   ;;  %s795_s25 = smov 126   ;;  %vm796_vm0 = vmmov 0  }
  0x25   : > { %600 = vmatprep.subr.mxu0 %v794_v0  ;;  %607 = vmatprep.subr.mxu1 %v794_v0  ;;  %s797_s27 = smov 2   ;;  %v798_v6 = vmov 0   ;;  %v309_v7 = vld [vmem:[%s963_s2] sm:$0xf]  ;;  %vm283_vm1 = vcmask 1027072   ;;  %vm272_vm2 = vcmask 11264  }
  0x26   : > { %s244_s14 = scalar_select %p243_p12, %s783_s21, 1  ;;  %604 = vmatprep.mubr.msk.f32.mxu0 %vm796_vm0, %v794_v0  ;;  %609 = vmatprep.mubr.msk.f32.mxu1 %vm796_vm0, %v794_v0  ;;  %vm304_vm3 = vcmask 1044464   ;;  %vm278_vm4 = vcmask 1043472   ;;  %vm319_vm5 = vcmask 1043456   ;;  %v306_v13 = vld [vmem:[#allocation3] sm:$0xf] }
  0x27   : > { %683 = vset.pattern.permute.xlu0 %v798_v6  ;;  %684 = vset.pattern.permute.xlu1 %v798_v6  ;;  %vm315_vm6 = vcmask 97280   ;;  %v395_v15 = vld [vmem:[%s965_s4] sm:$0xf]  ;;  %vm401_vm7 = vcmask 31744   ;;  %s240_s12 = sand.u32 1, %s775_s19   ;;  %s799_s7 = smov [#allocation6]  }
  0x28   : > { %s586_s15 = sshll.u32 %s244_s14, 2  ;;  %v394_v21 = vld [vmem:[%s964_s3] sm:$0xf]  ;;  %s585_s13 = sshll.u32 %s240_s12, 2 }
  0x29   : > { %s246_s24 = scalar_lea.vmem %s961_s0, %s586_s15  ;;  %s592_s14 = sshll.u32 %s783_s21, 6 }
  0x2a   : > { %v251_v1 = vld [vmem:[%s246_s24] sm:$0xf]  ;;  %s242_s15 = scalar_lea.vmem [#allocation6], %s585_s13  ;;  %s715_s8 = sshll.u32 %s799_s7, 4  ;;  %s716_s8 = int_to_ptr.vmem [resolvable:$false] %s715_s8 }
  0x2b   : > { %v263_v2 = vld [vmem:[%s246_s24] sm:$0xf]  ;;  %280 = vrot.lane.b32.xlu0 %v251_v1, %s795_s25  ;;  %252 = vst [vmem:[#allocation2 + $0x4] sm:$0xf] %v251_v1  ;;  %s495_s16 = sshll.u32 %s242_s15, 4  ;;  %s717_s21 = scalar_lea.vmem %s716_s8, 128  ;;  %s496_s16 = int_to_ptr.vmem [resolvable:$true] %s495_s16 }
  0x2c   : > { %v295_v3 = vld [vmem:[%s246_s24] sm:$0xf]  ;;  %v267_v4 = vmul.f32 0.0, %v263_v2  ;;  %s711_s29 = scalar_lea.vmem %s496_s16, 64  ;;  %p718_p0 = scmp.lt.s32.totalorder %s496_s16, %s716_s8 }
  0x2d   : > { %v299_v5 = vmul.f32 0.0, %v295_v3  ;;  %p712_p10 = scmp.ne.s32.totalorder %s496_s16, %s711_s29  ;;  %p719_p1 = scmp.lt.s32.totalorder %s717_s21, %s711_s29 }
  0x2e   : > { %269 = vrot.lane.b32.xlu1 %v267_v4, %s797_s27 }
  0x2f   : > { %301 = vrot.lane.b32.xlu0 %v299_v5, %s795_s25  ;;  %s493_s25 = scalar_lea.hbm %s966_s5, %s592_s14  ;;  %p713_p11 = pnand %p712_p10, %p870_p4 }
  0x30   : > { %p720_p2 = por %p719_p1, %p718_p0 }
  0x31   : > { %p714_p13 = pneg %p713_p11 }
  0x32   : > { %275 = vrot.lane.b32.xlu1 %v251_v1, %s797_s27  ;;  %s481_s27 = scalar_lea.sflag [#allocation5], %s240_s12 }
  0x33   : > { %312 = vperm.xlu0 %683, %v309_v7   ;;  %p721_p3 = pnand %p720_p2, %p714_p13 }
  0x36   : > { %398 = vperm.xlu1 %684, %v395_v15  }
  0x9d   : > { %v281_v8 = vpop.permute.xlu0 %280 }
  0x9e   : > { %284 = vst.msk [vmem:[#allocation2 + $0x8] sm:$0xf] %vm283_vm1, %v281_v8 }
  0xa0   : > { %v270_v9 = vpop.permute.xlu1 %269 }
  0xa1   : > { %273 = vst.msk [vmem:[#allocation2] sm:$0xf] %vm272_vm2, %v270_v9  ;;  %v302_v10 = vpop.permute.xlu0 %301 }
  0xa2   : > { %305 = vst.msk [vmem:[#allocation2 + $0x8] sm:$0xf] %vm304_vm3, %v302_v10 }
  0xa4   : > { %v276_v11 = vpop.permute.xlu1 %275 }
  0xa5   : > { %279 = vst.msk [vmem:[#allocation2] sm:$0xf] %vm278_vm4, %v276_v11 }
  0xa9   : > { %v308_v12 = vld [vmem:[#allocation2 + $0x8] sm:$0xf] }
  0xaa   : > { %601 = vmatpush3.msk.msra.mxu0 %vm319_vm5, %v308_v12 }
  0xab   : > { %602 = vmatprep.subr.mxu0 %v794_v0 }
  0xac   : > { %v307_v14 = vld [vmem:[#allocation2] sm:$0xff] }
  0xad   : > { %603 = vmatpush3.msra.mxu0 %v307_v14 }
  0xae   : > { %605 = vmatmul.mubr.msk.f32.vlgmr.msra.gmra.mxu0 %vm315_vm6, %v306_v13  ;;  %v313_v16 = vpop.permute.xlu0 %312 }
  0xb1   : > { %v399_v22 = vpop.permute.xlu1 %398 }
 0x16e   : > { %v389_v17 = vpop.f32.mrf.mxu0 }
 0x16f   : > { %v390_v18 = vadd.f32 %v389_v17, %v313_v16 }
 0x170   : > { %v606_v19 = vpop.f32.mrf.mxu0 }
 0x171   : > { %v393_v20 = vmax.f32 %v390_v18, 0.0 }
 0x173   : > { %608 = vmatpush3.msk.msra.mxu1 %vm319_vm5, %v393_v20 }
 0x174   : > { %610 = vmatmul.mubr.msk.f32.vlgmr.msra.gmra.mxu1 %vm401_vm7, %v394_v21 }
 0x234   : > { %v474_v23 = vpop.f32.mrf.mxu1 }
 0x235   : > { %v475_v24 = vadd.f32 %v474_v23, %v399_v22 }
 0x236   : > { %v611_v25 = vpop.f32.mrf.mxu1 }
 0x237   : > { %v478_v26 = vadd.f32 %v475_v24, %v251_v1 }
 0x239   : > { %479 = vst [vmem:[%s242_s15] sm:$0xf] %v478_v26 }
 0x23a   : > { %724 = shalt.err (!%p721_p3)
}
 0x23b   : > { %s725_s9 = scalar_lea.hbm %s493_s25, 64  ;;  %s729_s12 = scalar_lea.hbm %s966_s5, 128 }
 0x23c   : > { %p726_p5 = scmp.ne.s32.totalorder %s493_s25, %s725_s9  ;;  %p730_p9 = scmp.lt.s32.totalorder %s493_s25, %s966_s5 }
 0x23d   : > { %p731_p12 = scmp.lt.s32.totalorder %s729_s12, %s725_s9 }
 0x23e   : > { %p727_p6 = pnand %p726_p5, %p870_p4 }
 0x23f   : > { %p732_p10 = por %p731_p12, %p730_p9 }
 0x240   : > { %p728_p7 = pneg %p727_p6 }
 0x242   : > { %p733_p11 = pnand %p732_p10, %p728_p7 }
 0x244   : > { %736 = shalt.err (!%p733_p11)
}
 0x245   : > { %616 = dma.vmem_to_hbm [thread:$0]  (%p870_p4), %s496_s16, 64, %s493_s25, %s481_s27  }
 0x246 PF: > { %p628_p13 = scmp.ge.s32.totalorder %s791_s23, 2  ;;  %s507_s15 = sand.u32 1, %s771_s18  }
 0x247   : > { %s508_s17 = scalar_lea.sflag [#allocation5], %s507_s15 }
 0x248   : > { %p623_p0 = pnand %p628_p13, %p877_p8 }
 0x24a   : > { %p624_p1 = pneg %p623_p0 }
 0x24c   : > { %766 = dma.done.wait (%p624_p1), %s508_s17, 64  }
 0x24d   : > { %768 = vsyncadd (%p624_p1), %s508_s17, 4294967232  ;;  %s19_s23 = sadd.s32 1, %s791_s23   ;;  %s971_s18 = smov %s775_s19 }
 0x24e   : > { %p16_p2 = scmp.ge.s32.totalorder %s19_s23, 4   ;;  %s972_s19 = smov %s779_s20 }
 0x24f   : > { %s973_s20 = smov %s883_s6  ;;  %s974_s21 = smov %s787_s22 }
 0x250   : > { %s975_s22 = smov %s977_s26  ;;  %18 = sbr.rel (!%p16_p2) target bundleno = 5 (0x5), region = 83 }
 0x255   :  { %513 = vsyncpa [#allocation4], 1 }
 0x256   :  { %515 = vsyncpa [#allocation4 + $0x1], 1 }
 0x257   :  { %516 = vsyncpa [#allocation5], 1 }
 0x258   :  { %518 = vsyncpa [#allocation5 + $0x1], 1 }

</bundles_post_ra>
